<compile_context>
chip_gen: v6e
topology: v6e:2x2x1
jax: 0.10.0
libtpu: 0.0.40
codegen_flags: <defaults>
</compile_context>

<pallas_src>
import functools

import jax
import jax.numpy as jnp
import numpy as np
from jax.experimental import pallas as pl
from jax.experimental.pallas import tpu as pltpu


# ----------------------------- Pallas kernel ------------------------------

def _pooling_aggregator_kernel(a3_ref, hdst_ref, ht_ref, wmlp_ref, bmlp_ref,
                               wpool_ref, wself_ref, b_ref, o_ref, *,
                               apply_activation):
    # a3_ref   : (TD, 1, N)  adjacency rows of this dst tile, A[dst, 1, src]
    # hdst_ref : (TD, F)     self features of this dst tile
    # ht_ref   : (F,  N)     all node features, transposed (sources)
    # wmlp_ref : (F,  F)     neighbor-MLP weight (out, in)
    # bmlp_ref : (F,  1)     neighbor-MLP bias (column)
    # wpool_ref: (F,  Fo)    W[:, :F].T   (pooled half of the concat weight)
    # wself_ref: (F,  Fo)    W[:, F:].T   (self   half of the concat weight)
    # b_ref    : (1,  Fo)
    # o_ref    : (TD, Fo)

    # --- neighbor MLP in transposed layout: z.T = relu(Wmlp @ h.T + bmlp)  -> (F, N)
    zt = jnp.dot(wmlp_ref[...], ht_ref[...], preferred_element_type=jnp.float32)
    zt = jnp.maximum(zt + bmlp_ref[...], 0.0)

    # --- masked max-pool over in-neighbors of this dst tile.
    # a3 is already laid out (TD, 1, N) so the mask broadcast is a sublane
    # broadcast and the reduction is a plain lane reduce -> (TD, F).
    a3 = a3_ref[...]
    masked = jnp.where(a3 > 0.0, zt[None, :, :], jnp.float32(-1e30))  # (TD, F, N)
    pooled = jnp.max(masked, axis=-1)                                 # (TD, F)

    # --- concat + linear, without materializing the concat:
    #     cat(pooled, h) @ W.T == pooled @ W[:, :F].T + h @ W[:, F:].T
    out = jnp.dot(pooled, wpool_ref[...], preferred_element_type=jnp.float32)
    out = out + jnp.dot(hdst_ref[...], wself_ref[...],
                        preferred_element_type=jnp.float32)
    out = out + b_ref[...]
    if apply_activation:
        out = jnp.maximum(out, 0.0)
    o_ref[...] = out


def pooling_aggregator(A, h, w_mlp, b_mlp, w, b, *, apply_activation=True,
                       tile_d=None):
    """Fused PoolingAggregator forward for a whole graph.

    A     : (N, N) float adjacency, A[dst, src] = 1 iff edge src -> dst
    h     : (N, F) node features
    w_mlp : (F, F), b_mlp: (F,)   neighbor MLP (relu)
    w     : (Fo, 2F), b: (Fo,)    linear over concat(pooled, h)
    """
    N, F = h.shape
    Fo = w.shape[0]
    assert w.shape[1] == 2 * F
    if tile_d is None:
        tile_d = N if N <= 128 else 128
    assert N % tile_d == 0 and tile_d % 8 == 0

    # One-time layout plumbing in the wrapper (not per grid step):
    a3 = jnp.asarray(A, jnp.float32).reshape(N, 1, N)   # (dst, 1, src)
    ht = jnp.asarray(h, jnp.float32).T                  # (F, N)
    bmlp_c = jnp.asarray(b_mlp, jnp.float32).reshape(F, 1)
    w_pool_t = jnp.asarray(w, jnp.float32)[:, :F].T     # (F, Fo)
    w_self_t = jnp.asarray(w, jnp.float32)[:, F:].T     # (F, Fo)
    b_r = jnp.asarray(b, jnp.float32).reshape(1, Fo)

    kernel = functools.partial(_pooling_aggregator_kernel,
                               apply_activation=apply_activation)
    return pl.pallas_call(
        kernel,
        out_shape=jax.ShapeDtypeStruct((N, Fo), jnp.float32),
        grid=(N // tile_d,),
        in_specs=[
            pl.BlockSpec((tile_d, 1, N), lambda i: (i, 0, 0)),  # A rows (dst tile)
            pl.BlockSpec((tile_d, F), lambda i: (i, 0)),        # self features
            pl.BlockSpec((F, N), lambda i: (0, 0)),             # h.T (all sources)
            pl.BlockSpec((F, F), lambda i: (0, 0)),             # Wmlp
            pl.BlockSpec((F, 1), lambda i: (0, 0)),             # bmlp
            pl.BlockSpec((F, Fo), lambda i: (0, 0)),            # W pooled half (T)
            pl.BlockSpec((F, Fo), lambda i: (0, 0)),            # W self half (T)
            pl.BlockSpec((1, Fo), lambda i: (0, 0)),            # b
        ],
        out_specs=pl.BlockSpec((tile_d, Fo), lambda i: (i, 0)),
        compiler_params=pltpu.CompilerParams(
            dimension_semantics=("parallel",)),                 # v7x: 2 TCs split tiles
    )(a3, h, ht, w_mlp, bmlp_c, w_pool_t, w_self_t, b_r)


# ----------------------------- parameter init -----------------------------

def xavier_uniform(key, out_feats, in_feats, gain):
    bound = gain * np.sqrt(6.0 / (in_feats + out_feats))
    return jax.random.uniform(key, (out_feats, in_feats), jnp.float32,
                              minval=-bound, maxval=bound)


def linear_bias(key, out_feats, in_feats):
    bound = 1.0 / np.sqrt(in_feats)
    return jax.random.uniform(key, (out_feats,), jnp.float32,
                              minval=-bound, maxval=bound)


# ------------------------------- reference --------------------------------

def pooling_aggregator_ref(A, h, w_mlp, b_mlp, w, b, apply_activation):
    z = jnp.maximum(h @ w_mlp.T + b_mlp[None, :], 0.0)            # (N, F)
    masked = jnp.where(A[:, :, None] > 0, z[None, :, :], -jnp.inf)
    pooled = jnp.max(masked, axis=1)                              # (N, F)
    cat = jnp.concatenate([pooled, h], axis=1)                    # (N, 2F)
    out = cat @ w.T + b[None, :]
    if apply_activation:
        out = jnp.maximum(out, 0.0)
    return out


# ----------------------------------- main ----------------------------------

if __name__ == "__main__":
    key = jax.random.PRNGKey(0)

    N = 32               # nodes
    in_feats = 16        # F
    out_feats = 32       # Fo
    tile_d = 16          # dst-row tile -> grid of 2 "parallel" steps

    # synthetic directed graph: node i has in-edges from (i-1)%N and (i+3)%N
    A = np.zeros((N, N), dtype=np.float32)
    for i in range(N):
        A[i, (i - 1) % N] = 1.0
        A[i, (i + 3) % N] = 1.0
    A = jnp.asarray(A)   # in-degree >= 1 everywhere

    key, kh, kw1, kb1, kw2, kb2 = jax.random.split(key, 6)
    h = jax.random.normal(kh, (N, in_feats), jnp.float32)

    gain = float(np.sqrt(2.0))                         # calculate_gain('relu')
    w_mlp = xavier_uniform(kw1, in_feats, in_feats, gain)      # MLP: F -> F
    b_mlp = linear_bias(kb1, in_feats, in_feats)
    w = xavier_uniform(kw2, out_feats, 2 * in_feats, gain)     # linear: 2F -> Fo
    b = linear_bias(kb2, out_feats, 2 * in_feats)

    out = pooling_aggregator(A, h, w_mlp, b_mlp, w, b,
                             apply_activation=True, tile_d=tile_d)
    out = jax.block_until_ready(out)

    ref = pooling_aggregator_ref(A, h, w_mlp, b_mlp, w, b, True)
    np.testing.assert_allclose(np.asarray(out), np.asarray(ref),
                               rtol=1e-4, atol=1e-4)

    print("KERNEL_OK")
</pallas_src>

<mosaic_0001>
module attributes {stable_mosaic.version = 11 : i64} {
  func.func @_pooling_aggregator_kernel(%arg0: i32, %arg1: memref<16x1x32xf32, #tpu.memory_space<vmem>>, %arg2: memref<16x16xf32, #tpu.memory_space<vmem>>, %arg3: memref<16x32xf32, #tpu.memory_space<vmem>>, %arg4: memref<16x16xf32, #tpu.memory_space<vmem>>, %arg5: memref<16x1xf32, #tpu.memory_space<vmem>>, %arg6: memref<16x32xf32, #tpu.memory_space<vmem>>, %arg7: memref<16x32xf32, #tpu.memory_space<vmem>>, %arg8: memref<1x32xf32, #tpu.memory_space<vmem>>, %arg9: memref<16x32xf32, #tpu.memory_space<vmem>>) attributes {dimension_semantics = [#tpu.dimension_semantics<parallel>], iteration_bounds = array<i64: 2>, scalar_prefetch = 0 : i64, scratch_operands = 0 : i64, tpu.core_type = #tpu.core_type<tc>, window_params = [{transform_indices = @transform_0, window_bounds = array<i64: 16, 1, 32>}, {transform_indices = @transform_1, window_bounds = array<i64: 16, 16>}, {pipeline_mode = #tpu.pipeline_mode<synchronous>, transform_indices = @transform_2, window_bounds = array<i64: 16, 32>}, {pipeline_mode = #tpu.pipeline_mode<synchronous>, transform_indices = @transform_3, window_bounds = array<i64: 16, 16>}, {pipeline_mode = #tpu.pipeline_mode<synchronous>, transform_indices = @transform_4, window_bounds = array<i64: 16, 1>}, {pipeline_mode = #tpu.pipeline_mode<synchronous>, transform_indices = @transform_5, window_bounds = array<i64: 16, 32>}, {pipeline_mode = #tpu.pipeline_mode<synchronous>, transform_indices = @transform_6, window_bounds = array<i64: 16, 32>}, {pipeline_mode = #tpu.pipeline_mode<synchronous>, transform_indices = @transform_7, window_bounds = array<i64: 1, 32>}, {transform_indices = @transform_8, window_bounds = array<i64: 16, 32>}]} {
    %c0 = arith.constant 0 : index
    %c0_0 = arith.constant 0 : index
    %0 = vector.load %arg4[%c0, %c0_0] : memref<16x16xf32, #tpu.memory_space<vmem>>, vector<16x16xf32>
    %c0_1 = arith.constant 0 : index
    %c0_2 = arith.constant 0 : index
    %1 = vector.load %arg3[%c0_1, %c0_2] : memref<16x32xf32, #tpu.memory_space<vmem>>, vector<16x32xf32>
    %cst = arith.constant dense<0.000000e+00> : vector<16x32xf32>
    %2 = tpu.matmul %0, %1, %cst {dimension_numbers = #tpu.dot_dimension_numbers<[1], [0], [0], [1], [0, 0, 1, 1], [], []>} : vector<16x16xf32>, vector<16x32xf32>, vector<16x32xf32> -> vector<16x32xf32>
    %c0_3 = arith.constant 0 : index
    %c0_4 = arith.constant 0 : index
    %3 = vector.load %arg5[%c0_3, %c0_4] : memref<16x1xf32, #tpu.memory_space<vmem>>, vector<16x1xf32>
    %4 = vector.broadcast %3 : vector<16x1xf32> to vector<16x32xf32>
    %5 = arith.addf %2, %4 : vector<16x32xf32>
    %cst_5 = arith.constant 0.000000e+00 : f32
    %6 = vector.broadcast %cst_5 : f32 to vector<16x32xf32>
    %7 = arith.maximumf %5, %6 : vector<16x32xf32>
    %c0_6 = arith.constant 0 : index
    %c0_7 = arith.constant 0 : index
    %c0_8 = arith.constant 0 : index
    %8 = vector.load %arg1[%c0_6, %c0_7, %c0_8] : memref<16x1x32xf32, #tpu.memory_space<vmem>>, vector<16x1x32xf32>
    %cst_9 = arith.constant 0.000000e+00 : f32
    %9 = vector.broadcast %cst_9 : f32 to vector<16x1x32xf32>
    %10 = arith.cmpf ogt, %8, %9 : vector<16x1x32xf32>
    %11 = vector.shape_cast %7 : vector<16x32xf32> to vector<1x16x32xf32>
    %cst_10 = arith.constant -1.000000e+30 : f32
    %12 = vector.shape_cast %10 : vector<16x1x32xi1> to vector<16x1x32xi1>
    %13 = vector.broadcast %12 : vector<16x1x32xi1> to vector<16x16x32xi1>
    %14 = vector.shape_cast %11 : vector<1x16x32xf32> to vector<1x16x32xf32>
    %15 = vector.broadcast %14 : vector<1x16x32xf32> to vector<16x16x32xf32>
    %16 = vector.broadcast %cst_10 : f32 to vector<16x16x32xf32>
    %17 = arith.select %13, %15, %16 : vector<16x16x32xi1>, vector<16x16x32xf32>
    %cst_11 = arith.constant dense<0xFF800000> : vector<16x16xf32>
    %18 = vector.multi_reduction <maximumf>, %17, %cst_11 [2] : vector<16x16x32xf32> to vector<16x16xf32>
    %c0_12 = arith.constant 0 : index
    %c0_13 = arith.constant 0 : index
    %19 = vector.load %arg6[%c0_12, %c0_13] : memref<16x32xf32, #tpu.memory_space<vmem>>, vector<16x32xf32>
    %cst_14 = arith.constant dense<0.000000e+00> : vector<16x32xf32>
    %20 = tpu.matmul %18, %19, %cst_14 {dimension_numbers = #tpu.dot_dimension_numbers<[1], [0], [0], [1], [0, 0, 1, 1], [], []>} : vector<16x16xf32>, vector<16x32xf32>, vector<16x32xf32> -> vector<16x32xf32>
    %c0_15 = arith.constant 0 : index
    %c0_16 = arith.constant 0 : index
    %21 = vector.load %arg2[%c0_15, %c0_16] : memref<16x16xf32, #tpu.memory_space<vmem>>, vector<16x16xf32>
    %c0_17 = arith.constant 0 : index
    %c0_18 = arith.constant 0 : index
    %22 = vector.load %arg7[%c0_17, %c0_18] : memref<16x32xf32, #tpu.memory_space<vmem>>, vector<16x32xf32>
    %cst_19 = arith.constant dense<0.000000e+00> : vector<16x32xf32>
    %23 = tpu.matmul %21, %22, %cst_19 {dimension_numbers = #tpu.dot_dimension_numbers<[1], [0], [0], [1], [0, 0, 1, 1], [], []>} : vector<16x16xf32>, vector<16x32xf32>, vector<16x32xf32> -> vector<16x32xf32>
    %24 = arith.addf %20, %23 : vector<16x32xf32>
    %c0_20 = arith.constant 0 : index
    %c0_21 = arith.constant 0 : index
    %25 = vector.load %arg8[%c0_20, %c0_21] : memref<1x32xf32, #tpu.memory_space<vmem>>, vector<1x32xf32>
    %26 = vector.broadcast %25 : vector<1x32xf32> to vector<16x32xf32>
    %27 = arith.addf %24, %26 : vector<16x32xf32>
    %cst_22 = arith.constant 0.000000e+00 : f32
    %28 = vector.broadcast %cst_22 : f32 to vector<16x32xf32>
    %29 = arith.maximumf %27, %28 : vector<16x32xf32>
    %c0_23 = arith.constant 0 : index
    %c0_24 = arith.constant 0 : index
    %30 = vector.load %arg9[%c0_23, %c0_24] : memref<16x32xf32, #tpu.memory_space<vmem>>, vector<16x32xf32>
    tpu.vector_store %arg9[%c0_23, %c0_24], %29 {strides = array<i32>} : memref<16x32xf32, #tpu.memory_space<vmem>>, vector<16x32xf32>,
    return
  }
  func.func @transform_0(%arg0: i32) -> (i32, i32, i32) {
    %c0_i32 = arith.constant 0 : i32
    %c0_i32_0 = arith.constant 0 : i32
    %c0_i32_1 = arith.constant 0 : i32
    return %arg0, %c0_i32, %c0_i32_0 : i32, i32, i32
  }
  func.func @transform_1(%arg0: i32) -> (i32, i32) {
    %c0_i32 = arith.constant 0 : i32
    %c0_i32_0 = arith.constant 0 : i32
    return %arg0, %c0_i32 : i32, i32
  }
  func.func @transform_2(%arg0: i32) -> (i32, i32) {
    %c0_i32 = arith.constant 0 : i32
    %c0_i32_0 = arith.constant 0 : i32
    %c0_i32_1 = arith.constant 0 : i32
    return %c0_i32, %c0_i32_0 : i32, i32
  }
  func.func @transform_3(%arg0: i32) -> (i32, i32) {
    %c0_i32 = arith.constant 0 : i32
    %c0_i32_0 = arith.constant 0 : i32
    %c0_i32_1 = arith.constant 0 : i32
    return %c0_i32, %c0_i32_0 : i32, i32
  }
  func.func @transform_4(%arg0: i32) -> (i32, i32) {
    %c0_i32 = arith.constant 0 : i32
    %c0_i32_0 = arith.constant 0 : i32
    %c0_i32_1 = arith.constant 0 : i32
    return %c0_i32, %c0_i32_0 : i32, i32
  }
  func.func @transform_5(%arg0: i32) -> (i32, i32) {
    %c0_i32 = arith.constant 0 : i32
    %c0_i32_0 = arith.constant 0 : i32
    %c0_i32_1 = arith.constant 0 : i32
    return %c0_i32, %c0_i32_0 : i32, i32
  }
  func.func @transform_6(%arg0: i32) -> (i32, i32) {
    %c0_i32 = arith.constant 0 : i32
    %c0_i32_0 = arith.constant 0 : i32
    %c0_i32_1 = arith.constant 0 : i32
    return %c0_i32, %c0_i32_0 : i32, i32
  }
  func.func @transform_7(%arg0: i32) -> (i32, i32) {
    %c0_i32 = arith.constant 0 : i32
    %c0_i32_0 = arith.constant 0 : i32
    %c0_i32_1 = arith.constant 0 : i32
    return %c0_i32, %c0_i32_0 : i32, i32
  }
  func.func @transform_8(%arg0: i32) -> (i32, i32) {
    %c0_i32 = arith.constant 0 : i32
    %c0_i32_0 = arith.constant 0 : i32
    return %arg0, %c0_i32 : i32, i32
  }
}

</mosaic_0001>

<bundles_post_ra>
// kernel: tpu_custom_call.1
= control target key start
LH: loop header
LB: loop body
LE: loop exit
PB: predicated region body
PF: predicated region fallthrough
CT: control target
= control target key end

     0   :  { %13 = vsyncpa [#allocation3], 0  ;;  %s2035_s0 = inlined_call_operand.vmem [shape: f32[32,1,32], index: 0, kind: input, shape index: {}]   ;;  %s2036_s1 = inlined_call_operand.vmem [shape: f32[32,16], index: 1, kind: input, shape index: {}]   ;;  %s2037_s2 = inlined_call_operand.vmem [shape: f32[16,32], index: 2, kind: input, shape index: {}]   ;;  %s2038_s3 = inlined_call_operand.vmem [shape: f32[16,16], index: 3, kind: input, shape index: {}]   ;;  %s2039_s4 = inlined_call_operand.vmem [shape: f32[16,1], index: 4, kind: input, shape index: {}]   ;;  %s2040_s5 = inlined_call_operand.hbm [shape: f32[16,32], index: 5, kind: input, shape index: {}]   ;;  %s2041_s6 = inlined_call_operand.hbm [shape: f32[16,32], index: 6, kind: input, shape index: {}]   ;;  %s2042_s7 = inlined_call_operand.vmem [shape: f32[1,32], index: 7, kind: input, shape index: {}]   ;;  %s2043_s8 = inlined_call_operand.hbm [shape: f32[32,32], index: 8, kind: output, shape index: {}]  }
   0x1   :  { %14 = vsyncpa [#allocation6], 0 }
   0x2   :  { %15 = vsyncpa [#allocation4], 0 }
   0x3   :  { %17 = vsyncpa [#allocation4 + $0x1], 0  ;;  %s1499_s27 = smov 0   ;;  %s1501_s28 = smov 0  }
   0x4   :  { %s1503_s29 = smov 0   ;;  %s1505_s30 = smov 0  }
   0x5 LB: > { %s1520_s9 = sadd.s32 4294967295, %s1444_s30   ;;  %s1200_s10 = sadd.s32 4294967294, %s1444_s30   ;;  %s1444_s30 = sphi %s1505_s30, %s2089_s30   ;;  %s1440_s29 = sphi %s1503_s29, %s2088_s29   ;;  %s1436_s28 = sphi %s1501_s28, %s2087_s28   ;;  %s1432_s27 = sphi %s1499_s27, %s2086_s27  }
   0x6   : > { %s1524_s11 = sadd.s32 1, %s1444_s30   ;;  %s208_s12 = sadd.s32 1, %s1440_s29 }
   0x7   : > { %s205_s13 = ssub.s32 %s1444_s30, %s1524_s11  ;;  %p218_p0 = scmp.ne.s32.totalorder %s1440_s29, %s1436_s28 }
   0x8   : > { %p206_p1 = scmp.eq.s32.totalorder %s205_s13, 0  ;;  %p219_p2 = scmp.eq.s32.totalorder %s1520_s9, 1 }
   0x9   : > { %p224_p3 = scmp.ne.s32.totalorder %s1436_s28, %s1432_s27  ;;  %p225_p4 = scmp.eq.s32.totalorder %s1200_s10, 1 }
   0xa   : > { %s1535_s14 = scalar_select %p206_p1, %s1440_s29, %s208_s12  }
   0xb   : > { %p1537_p5 = por %p219_p2, %p218_p0  ;;  %p1541_p6 = por %p225_p4, %p224_p3 }
   0xc   : > { %p1201_p7 = scmp.ge.s32.totalorder %s1444_s30, 1  ;;  %p232_p8 = scmp.lt.s32.totalorder %s1444_s30, 3 }
   0xd   : > { %s2046_s16 = scalar_select %p1541_p6, 1, 0 }
   0xe   : > { %p2044_p9 = scmp.eq.s32.totalorder %s1520_s9, 0  ;;  %p1548_p10 = pnand %p1201_p7, %p232_p8 }
   0xf   : > { %s1446_s18 = smov [#allocation2]   ;;  %s1447_s21 = smov [#allocation5]  }
  0x10   : > { %s253_s19 = sshll.u32 %s1446_s18, 4  ;;  %p1268_p11 = pneg %p1548_p10  ;;  %s254_s19 = int_to_ptr.vmem [resolvable:$true] %s253_s19 }
  0x11   : > { %s266_s22 = sshll.u32 %s1447_s21, 4  ;;  %s1335_s23 = scalar_lea.vmem %s254_s19, 256  ;;  %s267_s22 = int_to_ptr.vmem [resolvable:$true] %s266_s22 }
  0x12   : > { %p1556_p12 = pnand %p2044_p9, %p1268_p11  ;;  %p1336_p0 = scmp.ne.s32.totalorder %s254_s19, %s1335_s23 }
  0x13   : > { %p1343_p3 = scmp.lt.s32.totalorder %s254_s19, %s254_s19  ;;  %p1344_p4 = scmp.lt.s32.totalorder %s1335_s23, %s1335_s23 }
  0x14   : > { %p1326_p13 = pneg %p1556_p12 }
  0x15   : > { %p1345_p7 = por %p1344_p4, %p1343_p3 }
  0x16   : > { %p1338_p1 = pnand %p1336_p0, %p1326_p13 }
  0x18   : > { %p1339_p2 = pneg %p1338_p1 }
  0x1a   : > { %p1346_p8 = pnand %p1345_p7, %p1339_p2 }
  0x1c   : > { %1349 = shalt.err (!%p1346_p8)
}
  0x1d   : > { %s1448_s24 = smov 128   ;;  %s1449_s25 = smov 8  }
  0x1e   : > { %1271 = dma.hbm_to_vmem [thread:$0]  (!%p1556_p12), %s2040_s5, 256, %s254_s19, [#allocation3], %s1448_s24, %s1448_s24, %s1449_s25  }
  0x1f   : > { %s1361_s12 = scalar_lea.vmem %s267_s22, 256  ;;  %p1369_p9 = scmp.lt.s32.totalorder %s267_s22, %s267_s22 }
  0x20   : > { %p1362_p11 = scmp.ne.s32.totalorder %s267_s22, %s1361_s12  ;;  %p1370_p6 = scmp.lt.s32.totalorder %s1361_s12, %s1361_s12 }
  0x22   : > { %p1364_p0 = pnand %p1362_p11, %p1326_p13  ;;  %p1371_p3 = por %p1370_p6, %p1369_p9 }
  0x24   : > { %p1365_p1 = pneg %p1364_p0 }
  0x26   : > { %p1372_p2 = pnand %p1371_p3, %p1365_p1 }
  0x28   : > { %1375 = shalt.err (!%p1372_p2)
}
  0x29   : > { %1274 = dma.hbm_to_vmem [thread:$0]  (!%p1556_p12), %s2041_s6, 256, %s267_s22, [#allocation6], %s1448_s24, %s1448_s24, %s1449_s25  }
  0x2a   : > { %302 = sbr.rel (%p1548_p10) target bundleno = 688 (0x2b0), region = 52  ;;  %p2049_p4 = scmp.eq.s32.totalorder (!%p1548_p10), %s1520_s9, 0 }
  0x2f   : > { %1419 = dma.done.wait (%p2049_p4), [#allocation3], 256   ;;  %p2050_p13 = pmov %p2049_p4 }
  0x30   : > { %p2051_p7 = pmov %p2049_p4 }
  0x31   : > { %1421 = vsyncadd (%p2050_p13), [#allocation3], 4294967040 }
  0x32   : > { %1423 = dma.done.wait (%p2051_p7), [#allocation6], 256   ;;  %p2052_p6 = pmov %p2049_p4 }
  0x33   : > { %v1450_v0 = vmov 0   ;;  %vm372_vm0 = vcmask 130048   ;;  %v359_v1 = vld [vmem:[%s2037_s2 + $0x8] sm:$0xff]  ;;  %v358_v2 = vld [vmem:[%s2037_s2] sm:$0xff]  ;;  %s1209_s18 = sshll.u32 %s1520_s9, 4  ;;  %v504_v7 = vlaneseq  ;;  %vm616_vm11 = vcmask 261120  }
  0x34   : > { %1425 = vsyncadd (%p2052_p6), [#allocation6], 4294967040  ;;  %1323 = vset.pattern.permute.xlu0 %v1450_v0  ;;  %v356_v3 = vld [vmem:[%s2038_s3] sm:$0xff]  ;;  %1237 = vmatprep.subr.mxu0 %v359_v1  ;;  %v357_v5 = vld [vmem:[%s2038_s3 + $0x8] sm:$0xff]  ;;  %p345_p9 = scmp.lt.s32.totalorder %s1209_s18, 31  ;;  %s1210_s21 = sshll.u32 %s1520_s9, 1 }
  0x35   : > { %1241 = vmatprep.mubr.msk.f32.mxu0 %vm372_vm0, %v356_v3  ;;  %v360_v4 = vld [vmem:[%s2039_s4] sm:$0xff]  ;;  %1238 = vmatpush3.msra.mxu0 %v359_v1  ;;  %v361_v6 = vld [vmem:[%s2039_s4 + $0x8] sm:$0xff]  ;;  %v1618_v10 = vshrl.u32 %v504_v7, 7  ;;  %p350_p10 = scmp.lt.s32.totalorder %s1210_s21, 3  ;;  %s341_s26 = sand.u32 1, %s1436_s28  }
  0x36   : > { %364 = vperm.xlu0 %1323, %v360_v4   ;;  %1239 = vmatprep.subr.mxu0 %v358_v2  ;;  %s2091_s18 = smov (!%p345_p9, %s1209_s18), 31  ;;  %s1208_s10 = sshll.u32 %s341_s26, 4 }
  0x37   : > { %1240 = vmatpush3.msra.mxu0 %v358_v2  ;;  %s1613_s20 = scalar_lea.vmem %s2035_s0, %s2091_s18  ;;  %v1625_v14 = vsub.s32 0, %v1618_v10  ;;  %s2093_s21 = smov (!%p350_p10, %s1210_s21), 3 }
  0x38   : > { %1242 = vmatmul.mubr.msk.f32.vlgmr.msra.gmra.mxu0 %vm372_vm0, %v357_v5  ;;  %v459_v8 = vld [vmem:[%s1613_s20 + $0x3] sm:$0x1]  ;;  %v456_v9 = vld [vmem:[%s1613_s20] sm:$0x1]  ;;  %v466_v11 = vld [vmem:[%s1613_s20 + $0xa] sm:$0x1] }
  0x39   : > { %v457_v12 = vld [vmem:[%s1613_s20 + $0x1] sm:$0x1]  ;;  %vm475_vm1 = vcmp.gt.f32.partialorder %v459_v8, 0.0  ;;  %vm472_vm2 = vcmp.gt.f32.partialorder %v456_v9, 0.0  ;;  %vm482_vm3 = vcmp.gt.f32.partialorder %v466_v11, 0.0  ;;  %s1211_s22 = sshll.u32 %s2093_s21, 3 }
  0x3a   : > { %369 = vperm.xlu0 %1323, %v361_v6   ;;  %vm473_vm4 = vcmp.gt.f32.partialorder %v457_v12, 0.0  ;;  %v491_v15 = vsel %vm475_vm1, 1, %v1450_v0  ;;  %v488_v16 = vsel %vm472_vm2, 1, %v1450_v0  ;;  %v460_v17 = vld [vmem:[%s1613_s20 + $0x4] sm:$0x1]  ;;  %v498_v19 = vsel %vm482_vm3, 1, %v1450_v0  ;;  %s353_s25 = scalar_lea.vmem %s2036_s1, %s1211_s22 }
  0x3b   : > { %v458_v18 = vld [vmem:[%s1613_s20 + $0x2] sm:$0x1]  ;;  %v489_v20 = vsel %vm473_vm4, 1, %v1450_v0  ;;  %v519_v21 = vrot.slane %v491_v15, %v1625_v14  ;;  %v507_v22 = vrot.slane %v488_v16, %v1625_v14  ;;  %vm476_vm5 = vcmp.gt.f32.partialorder %v460_v17, 0.0  ;;  %v467_v23 = vld [vmem:[%s1613_s20 + $0xb] sm:$0x1] }
  0x3c   : > { %vm474_vm6 = vcmp.gt.f32.partialorder %v458_v18, 0.0  ;;  %v464_v24 = vld [vmem:[%s1613_s20 + $0x8] sm:$0x1]  ;;  %v547_v27 = vrot.slane %v498_v19, %v1625_v14  ;;  %v511_v28 = vrot.slane %v489_v20, %v1625_v14  ;;  %v492_v30 = vsel %vm476_vm5, 1, %v1450_v0  ;;  %v461_v35 = vld [vmem:[%s1613_s20 + $0x5] sm:$0x1] }
  0x3d   : > { %v490_v31 = vsel %vm474_vm6, 1, %v1450_v0  ;;  %vm1641_vm7 = vcmp.eq.s32.totalorder %v519_v21, 1  ;;  %vm1645_vm8 = vcmp.eq.s32.totalorder %v507_v22, 1  ;;  %vm483_vm9 = vcmp.gt.f32.partialorder %v467_v23, 0.0  ;;  %v465_v36 = vld [vmem:[%s1613_s20 + $0x9] sm:$0x1] }
  0x3e   : > { %vm480_vm10 = vcmp.gt.f32.partialorder %v464_v24, 0.0  ;;  %vm1653_vm12 = vcmp.eq.s32.totalorder %v547_v27, 1  ;;  %vm1657_vm13 = vcmp.eq.s32.totalorder %v511_v28, 1  ;;  %v523_v39 = vrot.slane %v492_v30, %v1625_v14  ;;  %v468_v49 = vld [vmem:[%s1613_s20 + $0xc] sm:$0x1]  ;;  %s1224_s18 = sshll.u32 %s1520_s9, 8 }
  0x3f   : > { %v515_v40 = vrot.slane %v490_v31, %v1625_v14  ;;  %v499_v43 = vsel %vm483_vm9, 1, %v1450_v0  ;;  %v496_v44 = vsel %vm480_vm10, 1, %v1450_v0  ;;  %vm477_vm14 = vcmp.gt.f32.partialorder %v461_v35, 0.0  ;;  %v462_v60 = vld [vmem:[%s1613_s20 + $0x6] sm:$0x1]  ;;  %s343_s19 = scalar_lea.vmem [#allocation7], %s1208_s10  ;;  %s1989_s22 = scalar_lea.hbm %s2043_s8, %s1224_s18 }
  0x40   : > { %vm481_vm15 = vcmp.gt.f32.partialorder %v465_v36, 0.0  ;;  %vm1680_vm1 = vcmp.eq.s32.totalorder %v523_v39, 1  ;;  %v551_v52 = vrot.slane %v499_v43, %v1625_v14  ;;  %v539_v53 = vrot.slane %v496_v44, %v1625_v14  ;;  %v469_v11 = vld [vmem:[%s1613_s20 + $0xd] sm:$0x1]  ;;  %v463_v19 = vld [vmem:[%s1613_s20 + $0x7] sm:$0x1] }
  0x41   : > { %vm1684_vm2 = vcmp.eq.s32.totalorder %v515_v40, 1  ;;  %v493_v54 = vsel %vm477_vm14, 1, %v1450_v0  ;;  %v497_v55 = vsel %vm481_vm15, 1, %v1450_v0  ;;  %vm484_vm3 = vcmp.gt.f32.partialorder %v468_v49, 0.0  ;;  %s1107_s17 = sshll.u32 %s343_s19, 4  ;;  %s1995_s9 = scalar_lea.sflag [#allocation4], %s341_s26  ;;  %s1991_s17 = int_to_ptr.vmem [resolvable:$true] %s1107_s17 }
  0x42   : > { %vm1701_vm4 = vcmp.eq.s32.totalorder %v551_v52, 1  ;;  %vm1705_vm5 = vcmp.eq.s32.totalorder %v539_v53, 1  ;;  %v527_v1 = vrot.slane %v493_v54, %v1625_v14  ;;  %v543_v2 = vrot.slane %v497_v55, %v1625_v14  ;;  %s1376_s23 = scalar_lea.vmem %s1991_s17, 256  ;;  %s1451_s24 = smov [#allocation7]  }
  0x43   : > { %v500_v3 = vsel %vm484_vm3, 1, %v1450_v0  ;;  %vm478_vm6 = vcmp.gt.f32.partialorder %v462_v60, 0.0  ;;  %vm485_vm14 = vcmp.gt.f32.partialorder %v469_v11, 0.0  ;;  %vm479_vm3 = vcmp.gt.f32.partialorder %v463_v19, 0.0  ;;  %p1377_p12 = scmp.ne.s32.totalorder %s1991_s17, %s1376_s23 }
  0x44   : > { %vm1722_vm9 = vcmp.eq.s32.totalorder %v527_v1, 1  ;;  %vm1726_vm10 = vcmp.eq.s32.totalorder %v543_v2, 1  ;;  %v494_v16 = vsel %vm478_vm6, 1, %v1450_v0  ;;  %v495_v35 = vsel %vm479_vm3, 1, %v1450_v0 }
  0x45   : > { %v531_v24 = vrot.slane %v494_v16, %v1625_v14  ;;  %v535_v43 = vrot.slane %v495_v35, %v1625_v14  ;;  %p1378_p8 = pnand %p1377_p12, %p1537_p5 }
  0x47   : > { %vm1757_vm6 = vcmp.eq.s32.totalorder %v531_v24, 1  ;;  %p1379_p11 = pneg %p1378_p8 }
  0xb1   : > { %v1622_v13 = vpop.permute.xlu0 %364 }
  0xb5   : > { %v370_v25 = vpop.permute.xlu0 %369 }
  0xf8   : > { %v1243_v26 = vpop.f32.mrf.mxu0 }
  0xf9   : > { %v451_v29 = vadd.f32 %v1243_v26, %v370_v25  ;;  %v501_v25 = vsel %vm485_vm14, 1, %v1450_v0 }
  0xfa   : > { %v445_v61 = vpop.f32.mrf.mxu0  ;;  %v559_v31 = vrot.slane %v501_v25, %v1625_v14  ;;  %v718_v25 = vld [vmem:[#allocation5 + $0x8] sm:$0xff] }
  0xfb   : > { %v1649_v34 = vmax.f32 %v451_v29, 0.0  ;;  %v446_v6 = vadd.f32 %v445_v61, %v1622_v13  ;;  %v555_v13 = vrot.slane %v500_v3, %v1625_v14  ;;  %1244 = vmatprep.subr.mxu1 %v718_v25 }
  0xfc   : > { %1245 = vmatpush3.msra.mxu1 %v718_v25 }
  0xfd   : > { %v591_v41 = vsel %vm1641_vm7, %v1649_v34, -1e+30  ;;  %v585_v42 = vsel %vm1645_vm8, %v1649_v34, -1e+30  ;;  %v605_v47 = vsel %vm1653_vm12, %v1649_v34, -1e+30 }
  0xfe   : > { %v638_v45 = vsel %vm616_vm11, %v591_v41, -inf  ;;  %v620_v46 = vsel %vm616_vm11, %v585_v42, -inf  ;;  %v587_v48 = vsel %vm1657_vm13, %v1649_v34, -1e+30  ;;  %v680_v56 = vsel %vm616_vm11, %v605_v47, -inf }
  0xff   : > { %639 = vmax.xlane.f32.xlu0 %v638_v45  ;;  %621 = vmax.xlane.f32.xlu1 %v620_v46  ;;  %v626_v57 = vsel %vm616_vm11, %v587_v48, -inf  ;;  %v593_v58 = vsel %vm1680_vm1, %v1649_v34, -1e+30  ;;  %v589_v59 = vsel %vm1684_vm2, %v1649_v34, -1e+30  ;;  %v1735_v20 = vmax.f32 %v446_v6, 0.0 }
 0x100   : > { %v644_v4 = vsel %vm616_vm11, %v593_v58, -inf  ;;  %v632_v5 = vsel %vm616_vm11, %v589_v59, -inf  ;;  %v607_v8 = vsel %vm1701_vm4, %v1649_v34, -1e+30  ;;  %v601_v9 = vsel %vm1705_vm5, %v1649_v34, -1e+30 }
 0x101   : > { %v686_v17 = vsel %vm616_vm11, %v607_v8, -inf  ;;  %v668_v18 = vsel %vm616_vm11, %v601_v9, -inf  ;;  %v595_v21 = vsel %vm1722_vm9, %v1649_v34, -1e+30  ;;  %v603_v22 = vsel %vm1726_vm10, %v1649_v34, -1e+30 }
 0x102   : > { %vm1743_vm15 = vcmp.eq.s32.totalorder %v555_v13, 1  ;;  %v650_v26 = vsel %vm616_vm11, %v595_v21, -inf  ;;  %v674_v27 = vsel %vm616_vm11, %v603_v22, -inf  ;;  %v584_v29 = vsel %vm1645_vm8, %v1735_v20, -1e+30 }
 0x103   : > { %681 = vmax.xlane.f32.xlu0 %v680_v56  ;;  %627 = vmax.xlane.f32.xlu1 %v626_v57  ;;  %v609_v28 = vsel %vm1743_vm15, %v1649_v34, -1e+30  ;;  %v617_v39 = vsel %vm616_vm11, %v584_v29, -inf  ;;  %v597_v33 = vsel %vm1757_vm6, %v1649_v34, -1e+30  ;;  %vm1772_vm8 = vcmp.eq.s32.totalorder %v559_v31, 1 }
 0x104   : > { %v692_v36 = vsel %vm616_vm11, %v609_v28, -inf  ;;  %v588_v40 = vsel %vm1684_vm2, %v1735_v20, -1e+30  ;;  %v470_v41 = vld [vmem:[%s1613_s20 + $0xe] sm:$0x1]  ;;  %v656_v44 = vsel %vm616_vm11, %v597_v33, -inf }
 0x105   : > { %v629_v45 = vsel %vm616_vm11, %v588_v40, -inf  ;;  %vm486_vm14 = vcmp.gt.f32.partialorder %v470_v41, 0.0  ;;  %v611_v46 = vsel %vm1772_vm8, %v1649_v34, -1e+30  ;;  %v600_v47 = vsel %vm1705_vm5, %v1735_v20, -1e+30 }
 0x106   : > { %v471_v48 = vld [vmem:[%s1613_s20 + $0xf] sm:$0x1]  ;;  %vm1786_vm2 = vcmp.eq.s32.totalorder %v535_v43, 1  ;;  %v502_v51 = vsel %vm486_vm14, 1, %v1450_v0  ;;  %v698_v52 = vsel %vm616_vm11, %v611_v46, -inf  ;;  %v665_v53 = vsel %vm616_vm11, %v600_v47, -inf }
 0x107   : > { %645 = vmax.xlane.f32.xlu0 %v644_v4  ;;  %633 = vmax.xlane.f32.xlu1 %v632_v5  ;;  %vm487_vm3 = vcmp.gt.f32.partialorder %v471_v48, 0.0  ;;  %v599_v54 = vsel %vm1786_vm2, %v1649_v34, -1e+30  ;;  %v602_v55 = vsel %vm1726_vm10, %v1735_v20, -1e+30  ;;  %v563_v56 = vrot.slane %v502_v51, %v1625_v14  ;;  %v713_v28 = vld [vmem:[#allocation2] sm:$0xff] }
 0x108   : > { %v503_v57 = vsel %vm487_vm3, 1, %v1450_v0  ;;  %v662_v58 = vsel %vm616_vm11, %v599_v54, -inf  ;;  %v671_v59 = vsel %vm616_vm11, %v602_v55, -inf  ;;  %v586_v60 = vsel %vm1657_vm13, %v1735_v20, -1e+30  ;;  %v716_v29 = vld [vmem:[%s353_s25 + $0x8] sm:$0xff] }
 0x109   : > { %v590_v61 = vsel %vm1641_vm7, %v1735_v20, -1e+30  ;;  %vm1809_vm5 = vcmp.eq.s32.totalorder %v563_v56, 1  ;;  %v567_v0 = vrot.slane %v503_v57, %v1625_v14  ;;  %v623_v1 = vsel %vm616_vm11, %v586_v60, -inf }
 0x10a   : > { %v635_v2 = vsel %vm616_vm11, %v590_v61, -inf  ;;  %v613_v38 = vsel %vm1809_vm5, %v1649_v34, -1e+30  ;;  %v604_v32 = vsel %vm1653_vm12, %v1735_v20, -1e+30  ;;  %v833_v56 = vand.u32 127, %v504_v7 }
 0x10b   : > { %687 = vmax.xlane.f32.xlu0 %v686_v17  ;;  %669 = vmax.xlane.f32.xlu1 %v668_v18  ;;  %vm1822_vm7 = vcmp.eq.s32.totalorder %v567_v0, 1  ;;  %v704_v14 = vsel %vm616_vm11, %v613_v38, -inf  ;;  %v677_v4 = vsel %vm616_vm11, %v604_v32, -inf  ;;  %v592_v6 = vsel %vm1680_vm1, %v1735_v20, -1e+30 }
 0x10c   : > { %v615_v5 = vsel %vm1822_vm7, %v1649_v34, -1e+30  ;;  %v641_v8 = vsel %vm616_vm11, %v592_v6, -inf  ;;  %v606_v9 = vsel %vm1701_vm4, %v1735_v20, -1e+30  ;;  %v1898_v61 = vsub.s32 %v833_v56, %v1618_v10 }
 0x10d   : > { %v710_v37 = vsel %vm616_vm11, %v615_v5, -inf  ;;  %v683_v11 = vsel %vm616_vm11, %v606_v9, -inf  ;;  %v594_v34 = vsel %vm1722_vm9, %v1735_v20, -1e+30  ;;  %v608_v15 = vsel %vm1743_vm15, %v1735_v20, -1e+30 }
 0x10e   : > { %v647_v50 = vsel %vm616_vm11, %v594_v34, -inf  ;;  %v689_v13 = vsel %vm616_vm11, %v608_v15, -inf  ;;  %v596_v62 = vsel %vm1757_vm6, %v1735_v20, -1e+30  ;;  %v610_v12 = vsel %vm1772_vm8, %v1735_v20, -1e+30 }
 0x10f   : > { %651 = vmax.xlane.f32.xlu0 %v650_v26  ;;  %675 = vmax.xlane.f32.xlu1 %v674_v27  ;;  %v653_v16 = vsel %vm616_vm11, %v596_v62, -inf  ;;  %v695_v17 = vsel %vm616_vm11, %v610_v12, -inf  ;;  %v598_v18 = vsel %vm1786_vm2, %v1735_v20, -1e+30  ;;  %v612_v21 = vsel %vm1809_vm5, %v1735_v20, -1e+30 }
 0x110   : > { %v659_v19 = vsel %vm616_vm11, %v598_v18, -inf  ;;  %v701_v22 = vsel %vm616_vm11, %v612_v21, -inf  ;;  %v614_v23 = vsel %vm1822_vm7, %v1735_v20, -1e+30  ;;  %v714_v26 = vld [vmem:[#allocation2 + $0x8] sm:$0xff]  ;;  %v717_v27 = vld [vmem:[#allocation5] sm:$0xff] }
 0x111   : > { %v707_v24 = vsel %vm616_vm11, %v614_v23, -inf  ;;  %1251 = vmatprep.subr.mxu0 %v714_v26  ;;  %1246 = vmatprep.subr.mxu1 %v717_v27  ;;  %v715_v20 = vld [vmem:[%s353_s25] sm:$0xff]  ;;  %vm843_vm12 = vcmask 130112   ;;  %vm980_vm13 = vcmask 1041409   ;;  %vm982_vm1 = vcmask 1042434   ;;  %s1380_s25 = sshll.u32 %s1451_s24, 4  ;;  %s1381_s25 = int_to_ptr.vmem [resolvable:$false] %s1380_s25 }
 0x112   : > { %1252 = vmatpush3.msra.mxu0 %v714_v26  ;;  %1247 = vmatpush3.msra.mxu1 %v717_v27  ;;  %vm984_vm4 = vcmask 1043459   ;;  %vm986_vm9 = vcmask 1044484   ;;  %vm988_vm10 = vcmask 1045509   ;;  %vm990_vm15 = vcmask 1046534   ;;  %s1382_s10 = scalar_lea.vmem %s1381_s25, 512  ;;  %p1383_p0 = scmp.lt.s32.totalorder %s1991_s17, %s1381_s25 }
 0x113   : > { %693 = vmax.xlane.f32.xlu0 %v692_v36  ;;  %618 = vmax.xlane.f32.xlu1 %v617_v39  ;;  %vm992_vm6 = vcmask 1047559   ;;  %p1384_p1 = scmp.lt.s32.totalorder %s1382_s10, %s1376_s23 }
 0x114   : > { %1253 = vmatprep.subr.mxu0 %v713_v28  ;;  %1248 = vmatprep.mubr.msk.f32.mxu1 %vm372_vm0, %v715_v20 }
 0x115   : > { %1254 = vmatpush3.msra.mxu0 %v713_v28  ;;  %1249 = vmatmul.mubr.msk.f32.vlgmr.msra.gmra.mxu1 %vm372_vm0, %v716_v29  ;;  %p1385_p3 = por %p1384_p1, %p1383_p0 }
 0x117   : > { %657 = vmax.xlane.f32.xlu0 %v656_v44  ;;  %630 = vmax.xlane.f32.xlu1 %v629_v45  ;;  %p1386_p2 = pnand %p1385_p3, %p1379_p11 }
 0x11b   : > { %699 = vmax.xlane.f32.xlu0 %v698_v52  ;;  %666 = vmax.xlane.f32.xlu1 %v665_v53 }
 0x11f   : > { %663 = vmax.xlane.f32.xlu0 %v662_v58  ;;  %672 = vmax.xlane.f32.xlu1 %v671_v59  ;;  %v838_v58 = vadd.s32 4294967288, %v833_v56 }
 0x121   : > { %v1901_v63 = vsub.s32 %v838_v58, %v1618_v10 }
 0x123   : > { %624 = vmax.xlane.f32.xlu0 %v623_v1  ;;  %636 = vmax.xlane.f32.xlu1 %v635_v2 }
 0x127   : > { %705 = vmax.xlane.f32.xlu0 %v704_v14  ;;  %678 = vmax.xlane.f32.xlu1 %v677_v4 }
 0x12b   : > { %711 = vmax.xlane.f32.xlu0 %v710_v37  ;;  %642 = vmax.xlane.f32.xlu1 %v641_v8 }
 0x12f   : > { %684 = vmax.xlane.f32.xlu1 %v683_v11 }
 0x133   : > { %648 = vmax.xlane.f32.xlu1 %v647_v50 }
 0x137   : > { %690 = vmax.xlane.f32.xlu1 %v689_v13 }
 0x13b   : > { %654 = vmax.xlane.f32.xlu1 %v653_v16 }
 0x13f   : > { %696 = vmax.xlane.f32.xlu1 %v695_v17 }
 0x143   : > { %660 = vmax.xlane.f32.xlu1 %v659_v19 }
 0x147   : > { %702 = vmax.xlane.f32.xlu1 %v701_v22 }
 0x14b   : > { %708 = vmax.xlane.f32.xlu1 %v707_v24 }
 0x188   : > { %v1874_v30 = vpop.xlane.xlu0 %639  ;;  %v622_v31 = vpop.xlane.xlu1 %621 }
 0x189   : > { %v842_v7 = vrot.slane %v622_v31, %v1901_v63  ;;  %v870_v15 = vrot.slane %v1874_v30, %v1901_v63 }
 0x18c   : > { %v1876_v35 = vpop.xlane.xlu0 %681  ;;  %v628_v36 = vpop.xlane.xlu1 %627 }
 0x18d   : > { %v852_v2 = vrot.slane %v628_v36, %v1901_v63  ;;  %v933_v16 = vrot.slane %v1876_v35, %v1901_v63 }
 0x190   : > { %v634_v39 = vpop.xlane.xlu1 %633  ;;  %v646_v33 = vpop.xlane.xlu0 %645 }
 0x191   : > { %v861_v10 = vrot.slane %v634_v39, %v1901_v63  ;;  %v879_v9 = vrot.slane %v646_v33, %v1901_v63 }
 0x194   : > { %v1878_v40 = vpop.xlane.xlu1 %669  ;;  %v1880_v41 = vpop.xlane.xlu0 %687 }
 0x195   : > { %v942_v35 = vrot.slane %v1880_v41, %v1901_v63  ;;  %v915_v36 = vrot.slane %v1878_v40, %v1901_v63 }
 0x198   : > { %v1882_v42 = vpop.xlane.xlu1 %675  ;;  %v652_v44 = vpop.xlane.xlu0 %651 }
 0x199   : > { %v888_v13 = vrot.slane %v652_v44, %v1901_v63  ;;  %v924_v18 = vrot.slane %v1882_v42, %v1901_v63 }
 0x19c   : > { %v619_v43 = vpop.xlane.xlu1 %618  ;;  %v1884_v46 = vpop.xlane.xlu0 %693 }
 0x19d   : > { %v837_v38 = vrot.slane %v619_v43, %v1898_v61 }
 0x19f   : > { %v844_v4 = vsel %vm843_vm12, %v842_v7, %v837_v38 }
 0x1a0   : > { %v631_v45 = vpop.xlane.xlu1 %630  ;;  %v658_v49 = vpop.xlane.xlu0 %657 }
 0x1a1   : > { %v857_v3 = vrot.slane %v631_v45, %v1898_v61  ;;  %v897_v12 = vrot.slane %v658_v49, %v1901_v63 }
 0x1a3   : > { %v862_v11 = vsel %vm843_vm12, %v861_v10, %v857_v3 }
 0x1a4   : > { %v1886_v47 = vpop.xlane.xlu1 %666  ;;  %v1890_v52 = vpop.xlane.xlu0 %699 }
 0x1a5   : > { %v911_v23 = vrot.slane %v1886_v47, %v1898_v61  ;;  %v951_v47 = vrot.slane %v1884_v46, %v1901_v63  ;;  %v960_v49 = vrot.slane %v1890_v52, %v1901_v63 }
 0x1a8   : > { %v1888_v48 = vpop.xlane.xlu1 %672  ;;  %v664_v55 = vpop.xlane.xlu0 %663 }
 0x1a9   : > { %v920_v19 = vrot.slane %v1888_v48, %v1898_v61  ;;  %v906_v20 = vrot.slane %v664_v55, %v1901_v63 }
 0x1ab   : > { %v925_v42 = vsel %vm843_vm12, %v924_v18, %v920_v19 }
 0x1ac   : > { %v637_v51 = vpop.xlane.xlu1 %636  ;;  %v625_v59 = vpop.xlane.xlu0 %624 }
 0x1ad   : > { %v848_v0 = vrot.slane %v625_v59, %v1898_v61  ;;  %v866_v37 = vrot.slane %v637_v51, %v1898_v61  ;;  %v916_v51 = vsel %vm843_vm12, %v915_v36, %v911_v23 }
 0x1ae   : > { %v994_v55 = vsel %vm980_vm13, %v925_v42, %v916_v51 }
 0x1af   : > { %v853_v32 = vsel %vm843_vm12, %v852_v2, %v848_v0  ;;  %v871_v21 = vsel %vm843_vm12, %v870_v15, %v866_v37 }
 0x1b0   : > { %v1892_v53 = vpop.xlane.xlu1 %678  ;;  %v981_v5 = vsel %vm980_vm13, %v853_v32, %v844_v4  ;;  %v706_v25 = vpop.xlane.xlu0 %705 }
 0x1b1   : > { %v983_v62 = vsel %vm982_vm1, %v862_v11, %v981_v5  ;;  %v929_v26 = vrot.slane %v1892_v53, %v1898_v61  ;;  %v969_v46 = vrot.slane %v706_v25, %v1901_v63 }
 0x1b2   : > { %v985_v24 = vsel %vm984_vm4, %v871_v21, %v983_v62 }
 0x1b3   : > { %v934_v41 = vsel %vm843_vm12, %v933_v16, %v929_v26 }
 0x1b4   : > { %v643_v54 = vpop.xlane.xlu1 %642  ;;  %v712_v56 = vpop.xlane.xlu0 %711  ;;  %v995_v58 = vsel %vm982_vm1, %v934_v41, %v994_v55 }
 0x1b5   : > { %v875_v6 = vrot.slane %v643_v54, %v1898_v61 }
 0x1b7   : > { %v880_v17 = vsel %vm843_vm12, %v879_v9, %v875_v6 }
 0x1b8   : > { %v1895_v57 = vpop.xlane.xlu1 %684  ;;  %v987_v29 = vsel %vm986_vm9, %v880_v17, %v985_v24 }
 0x1b9   : > { %v938_v30 = vrot.slane %v1895_v57, %v1898_v61 }
 0x1bb   : > { %v943_v53 = vsel %vm843_vm12, %v942_v35, %v938_v30 }
 0x1bc   : > { %v649_v60 = vpop.xlane.xlu1 %648  ;;  %v996_v59 = vsel %vm984_vm4, %v943_v53, %v995_v58 }
 0x1bd   : > { %v884_v8 = vrot.slane %v649_v60, %v1898_v61 }
 0x1bf   : > { %v889_v22 = vsel %vm843_vm12, %v888_v13, %v884_v8 }
 0x1c0   : > { %v1904_v1 = vpop.xlane.xlu1 %690  ;;  %v989_v39 = vsel %vm988_vm10, %v889_v22, %v987_v29 }
 0x1c1   : > { %v947_v33 = vrot.slane %v1904_v1, %v1898_v61  ;;  %v978_v1 = vrot.slane %v712_v56, %v1901_v63  ;;  %v1218_v63 = vld [vmem:[%s2042_s7] ss:$0 sm:$0xff] }
 0x1c3   : > { %v952_v57 = vsel %vm843_vm12, %v951_v47, %v947_v33 }
 0x1c4   : > { %v655_v14 = vpop.xlane.xlu1 %654  ;;  %v997_v2 = vsel %vm986_vm9, %v952_v57, %v996_v59 }
 0x1c5   : > { %v893_v34 = vrot.slane %v655_v14, %v1898_v61 }
 0x1c7   : > { %v898_v27 = vsel %vm843_vm12, %v897_v12, %v893_v34 }
 0x1c8   : > { %v697_v50 = vpop.xlane.xlu1 %696  ;;  %v991_v45 = vsel %vm990_vm15, %v898_v27, %v989_v39 }
 0x1c9   : > { %v956_v43 = vrot.slane %v697_v50, %v1898_v61 }
 0x1cb   : > { %v961_v52 = vsel %vm843_vm12, %v960_v49, %v956_v43 }
 0x1cc   : > { %v661_v28 = vpop.xlane.xlu1 %660  ;;  %v998_v7 = vsel %vm988_vm10, %v961_v52, %v997_v2 }
 0x1cd   : > { %v902_v31 = vrot.slane %v661_v28, %v1898_v61 }
 0x1cf   : > { %v907_v44 = vsel %vm843_vm12, %v906_v20, %v902_v31 }
 0x1d0   : > { %v703_v48 = vpop.xlane.xlu1 %702  ;;  %v993_v40 = vsel %vm992_vm6, %v907_v44, %v991_v45 }
 0x1d1   : > { %v965_v54 = vrot.slane %v703_v48, %v1898_v61  ;;  %1255 = vmatprep.mubr.msk.f32.mxu0 %vm372_vm0, %v993_v40 }
 0x1d3   : > { %v970_v60 = vsel %vm843_vm12, %v969_v46, %v965_v54 }
 0x1d4   : > { %v709_v0 = vpop.xlane.xlu1 %708  ;;  %v999_v32 = vsel %vm990_vm15, %v970_v60, %v998_v7 }
 0x1d5   : > { %v974_v38 = vrot.slane %v709_v0, %v1898_v61  ;;  %v1250_v4 = vpop.f32.mrf.mxu1 }
 0x1d7   : > { %v979_v3 = vsel %vm843_vm12, %v978_v1, %v974_v38  ;;  %v791_v5 = vpop.f32.mrf.mxu1 }
 0x1d8   : > { %v1000_v14 = vsel %vm992_vm6, %v979_v3, %v999_v32 }
 0x1d9   : > { %1256 = vmatmul.mubr.msk.f32.vlgmr.msra.gmra.mxu0 %vm372_vm0, %v1000_v14 }
 0x299   : > { %v1257_v10 = vpop.f32.mrf.mxu0 }
 0x29a   : > { %v1077_v61 = vadd.f32 %v1257_v10, %v1250_v4 }
 0x29b   : > { %v1071_v6 = vpop.f32.mrf.mxu0 }
 0x29c   : > { %v1088_v37 = vadd.f32 %v1218_v63, %v1077_v61  ;;  %v1072_v8 = vadd.f32 %v1071_v6, %v791_v5 }
 0x29e   : > { %v1090_v9 = vmax.f32 %v1088_v37, 0.0  ;;  %v1087_v11 = vadd.f32 %v1218_v63, %v1072_v8 }
 0x2a0   : > { %1092 = vst.msk [vmem:[%s343_s19 + $0x8] sm:$0xff] %vm616_vm11, %v1090_v9  ;;  %v1089_v34 = vmax.f32 %v1087_v11, 0.0 }
 0x2a2   : > { %1091 = vst.msk [vmem:[%s343_s19] sm:$0xff] %vm616_vm11, %v1089_v34 }
 0x2a3   : > { %1389 = shalt.err (!%p1386_p2)
}
 0x2a4   : > { %s1390_s26 = scalar_lea.hbm %s1989_s22, 256  ;;  %s1394_s18 = scalar_lea.hbm %s2043_s8, 512 }
 0x2a5   : > { %p1391_p4 = scmp.ne.s32.totalorder %s1989_s22, %s1390_s26  ;;  %p1395_p6 = scmp.lt.s32.totalorder %s1989_s22, %s2043_s8 }
 0x2a6   : > { %p1396_p9 = scmp.lt.s32.totalorder %s1394_s18, %s1390_s26 }
 0x2a7   : > { %p1392_p13 = pnand %p1391_p4, %p1537_p5 }
 0x2a8   : > { %p1397_p10 = por %p1396_p9, %p1395_p6 }
 0x2a9   : > { %p1393_p7 = pneg %p1392_p13 }
 0x2ab   : > { %p1398_p12 = pnand %p1397_p10, %p1393_p7 }
 0x2ad   : > { %1401 = shalt.err (!%p1398_p12)
}
 0x2ae   : > { %s1452_s21 = smov 128   ;;  %s1453_s23 = smov 8  }
 0x2af   : > { %1266 = dma.vmem_to_hbm [thread:$0]  (%p1537_p5), %s1991_s17, 256, %s1989_s22, %s1995_s9, %s1452_s21, %s1452_s21, %s1453_s23  }
 0x2b0 PF: > { %p1283_p8 = scmp.ge.s32.totalorder %s1444_s30, 2  ;;  %s1122_s24 = sand.u32 1, %s1432_s27  }
 0x2b1   : > { %p2085_p11 = scmp.ne.s32.totalorder %s2046_s16, 0  ;;  %s1123_s25 = scalar_lea.sflag [#allocation4], %s1122_s24 }
 0x2b3   : > { %p1276_p0 = pnand %p1283_p8, %p2085_p11 }
 0x2b5   : > { %p1277_p1 = pneg %p1276_p0 }
 0x2b7   : > { %1427 = dma.done.wait (%p1277_p1), %s1123_s25, 256  }
 0x2b8   : > { %1429 = vsyncadd (%p1277_p1), %s1123_s25, 4294967040  ;;  %p20_p3 = scmp.ge.s32.totalorder %s1524_s11, 4   ;;  %s2086_s27 = smov %s1436_s28 }
 0x2b9   : > { %s2087_s28 = smov %s1440_s29  ;;  %s2088_s29 = smov %s1535_s14 }
 0x2ba   : > { %s2089_s30 = smov %s1524_s11  ;;  %22 = sbr.rel (!%p20_p3) target bundleno = 5 (0x5), region = 99 }
 0x2bf   :  { %1128 = vsyncpa [#allocation3], 1 }
 0x2c0   :  { %1130 = vsyncpa [#allocation3 + $0x1], 1 }
 0x2c1   :  { %1131 = vsyncpa [#allocation6], 1 }
 0x2c2   :  { %1132 = vsyncpa [#allocation4], 1 }
 0x2c3   :  { %1134 = vsyncpa [#allocation4 + $0x1], 1 }

</bundles_post_ra>
